<compile_context>
chip_gen: v5e
topology: v5e:2x2
jax: 0.10.0
libtpu: 0.0.40
codegen_flags: <defaults>
</compile_context>

<pallas_src>
import jax
import jax.numpy as jnp
import numpy as np
from jax.experimental import pallas as pl
from jax.experimental.pallas import tpu as pltpu

_SUB = 256                      # lanes per in-kernel strip (also batch-tile granularity)
_NT_DIMS = (((1,), (1,)), ((), ()))   # contract dim 1 of both operands: A @ B^T


# --------------------------------------------------------------------------------------
# small helpers
# --------------------------------------------------------------------------------------
def _round_up(x, m):
    return ((x + m - 1) // m) * m


def _round_down(x, m):
    return (x // m) * m


def _device_kind():
    try:
        dev = jax.devices()[0]
        if dev.platform != "tpu":
            return ""
        return dev.device_kind.lower()
    except Exception:  # pragma: no cover - defensive
        return ""


def _num_tensorcores(kind):
    """1 for single-TC chips (v2/v3/v5e/v6e), 2 for megacore chips (v4/v5p/v7x)."""
    if not kind:
        return 1
    single = ("v2", "v3", "v5e", "v5 lite", "v5lite", "v6e", "v6 lite", "v6lite")
    if any(t in kind for t in single):
        return 1
    return 2


def _has_bf16_vpu(kind):
    """v6e / v7x VALUs operate natively on bf16; older generations do not."""
    return any(t in kind for t in ("v6", "v7", "7x"))


def _choose_block_b(B, num_tc, cap=2048):
    """Pick the batch tile.  B is already >= _SUB and the result divides into 256-strips.

    Single-TC: one stream of the biggest tiles (no pointless split).
    Dual-TC:   an even number of tiles so a 'parallel' grid load-balances both cores.
    The tile never exceeds B, so only the standard ragged *last* block can occur.
    """
    if num_tc <= 1:
        n_tiles = max(1, -(-B // cap))
    else:
        n_tiles = max(2, 2 * (-(-B // (2 * cap))))
    bb = _round_up(-(-B // n_tiles), _SUB)
    bb = min(bb, cap, max(_SUB, _round_down(B, _SUB)))
    return bb


# --------------------------------------------------------------------------------------
# kernel
# --------------------------------------------------------------------------------------
def _make_mlp_kernel(n_layers, sub, relu_in_bf16):
    """Fused MLP: relu(W@h + b) x (n_layers-1), then W@h + b, batch-on-lanes per strip."""

    def _relu_cast(acc_f32):
        if relu_in_bf16:
            # cast to the next layer's MXU dtype first, relu on packed bf16 vregs
            return jnp.maximum(acc_f32.astype(jnp.bfloat16), 0.0)
        # v5e: no bf16 VALU -> relu in f32, then the (anyway required) bf16 cast
        return jnp.maximum(acc_f32, 0.0).astype(jnp.bfloat16)

    def kernel(*refs):
        x_ref = refs[0]                       # (block_b, in_d) f32, natural row-major
        o_ref = refs[-1]                      # (block_b, out_d) natural row-major
        wb = refs[1:-1]                       # (W0, b0, W1, b1, ...)

        # Weights / biases are grid-resident and tiny: load once per grid step.
        ws = [wb[2 * l][...] for l in range(n_layers)]        # bf16, PyTorch (out, in)
        bs = [wb[2 * l + 1][...] for l in range(n_layers)]    # f32, (out, 1)

        n_strips = x_ref.shape[0] // sub

        def strip(s, carry):
            off = pl.multiple_of(s * sub, sub)
            x_rows = x_ref[pl.ds(off, sub), :].astype(jnp.bfloat16)   # (sub, in_d)

            # Layer 0 as A @ B^T: contracts in_d of W0 (out,in) with in_d of the rows,
            # producing (hidden, sub) with the batch on lanes -- no explicit input
            # transpose, and every later elementwise op is lane-dense.
            h = jax.lax.dot_general(ws[0], x_rows, _NT_DIMS,
                                    preferred_element_type=jnp.float32) + bs[0]
            h = _relu_cast(h)

            for l in range(1, n_layers - 1):
                h = _relu_cast(jnp.dot(ws[l], h,
                                       preferred_element_type=jnp.float32) + bs[l])

            # Final Linear, no activation.  (out_d, sub) f32.
            h = jnp.dot(ws[-1], h, preferred_element_type=jnp.float32) + bs[-1]

            # One f32 transpose per strip (XLU) back to batch-major rows for the store.
            o_ref[pl.ds(off, sub), :] = jnp.transpose(h).astype(o_ref.dtype)
            return carry

        jax.lax.fori_loop(0, n_strips, strip, 0, unroll=True)

    return kernel


# --------------------------------------------------------------------------------------
# wrapper
# --------------------------------------------------------------------------------------
def small_encoder_1d_forward(x, params, *, out_dtype=jnp.float32, block_b_cap=2048):
    """x: [B, in_d] float32.  params: list of (W, b), W shaped (out, in) like PyTorch."""
    x = jnp.asarray(x, jnp.float32)
    B, in_d = x.shape
    n_layers = len(params)
    assert n_layers >= 2, "SmallEncoder1d always has at least two Linear layers"
    out_d = params[-1][0].shape[0]

    kind = _device_kind()
    num_tc = _num_tensorcores(kind)
    relu_in_bf16 = _has_bf16_vpu(kind)

    # Tiny-batch safety path only: pad rows up to one 256-strip (a few KiB, irrelevant).
    # Large batches are fed with zero host-side reshaping / transposition.
    B_run = B
    if B < _SUB:
        B_run = _SUB
        x = jnp.pad(x, ((0, B_run - B), (0, 0)))

    block_b = _choose_block_b(B_run, num_tc, cap=block_b_cap)
    grid = (pl.cdiv(B_run, block_b),)
    sub = min(_SUB, block_b)

    # Param layout plumbing (tiny arrays): bf16 weights in PyTorch (out, in) layout,
    # f32 biases as (out, 1) columns so they broadcast along the lane (batch) axis.
    wts = [jnp.asarray(w, jnp.float32).astype(jnp.bfloat16) for (w, _) in params]
    bss = [jnp.asarray(b, jnp.float32).reshape(-1, 1) for (_, b) in params]

    in_specs = [pl.BlockSpec((block_b, in_d), lambda i: (i, 0))]
    operands = [x]
    for w, b in zip(wts, bss):
        in_specs.append(pl.BlockSpec(w.shape, lambda i: (0, 0)))   # grid-resident
        in_specs.append(pl.BlockSpec(b.shape, lambda i: (0, 0)))   # grid-resident
        operands += [w, b]
    out_spec = pl.BlockSpec((block_b, out_d), lambda i: (i, 0))

    # Advisory cost estimate (true B, not padded).
    flops = 2 * B * sum(int(w.shape[0]) * int(w.shape[1]) for (w, _) in params)
    bytes_accessed = int(B * in_d * 4
                         + B * out_d * np.dtype(out_dtype).itemsize
                         + sum(int(w.size) * 2 for w in wts)
                         + sum(int(b.size) * 4 for b in bss))
    cost = pl.CostEstimate(flops=flops, transcendentals=0, bytes_accessed=bytes_accessed)

    y = pl.pallas_call(
        _make_mlp_kernel(n_layers, sub, relu_in_bf16),
        out_shape=jax.ShapeDtypeStruct((B_run, out_d), out_dtype),
        grid=grid,
        in_specs=in_specs,
        out_specs=out_spec,
        compiler_params=pltpu.CompilerParams(dimension_semantics=("parallel",)),
        cost_estimate=cost,
    )(*operands)

    return y[:B] if B_run != B else y


# --------------------------------------------------------------------------------------
# parameter init (mimics torch.nn.Linear default) and pure-JAX reference
# --------------------------------------------------------------------------------------
def init_params(key, in_d, out_d, num_hidden=3):
    hidden = 3 * in_d
    dims = [(in_d, hidden)] + [(hidden, hidden)] * (num_hidden - 1) + [(hidden, out_d)]
    params = []
    for (fan_in, fan_out) in dims:
        key, kw, kb = jax.random.split(key, 3)
        bound = 1.0 / jnp.sqrt(fan_in)
        W = jax.random.uniform(kw, (fan_out, fan_in), jnp.float32, -bound, bound)
        b = jax.random.uniform(kb, (fan_out,), jnp.float32, -bound, bound)
        params.append((W, b))
    return params


def reference_forward(x, params):
    out = x
    for (W, b) in params[:-1]:
        out = jnp.maximum(out @ W.T + b, 0.0)
    W, b = params[-1]
    return out @ W.T + b


# --------------------------------------------------------------------------------------
if __name__ == "__main__":
    key = jax.random.PRNGKey(0)
    in_d, out_d, num_hidden = 16, 32, 3          # hidden = 48, four Linear layers

    k_p, k_x = jax.random.split(key)
    params = init_params(k_p, in_d, out_d, num_hidden)

    # batch=10  -> tiny-batch (padded single tile) path
    # batch=300 -> multi-tile path with a ragged last block (no host padding)
    for batch in (10, 300):
        kx = jax.random.fold_in(k_x, batch)
        x = jax.random.normal(kx, (batch, in_d), jnp.float32)

        y = jax.block_until_ready(small_encoder_1d_forward(x, params))
        y_ref = reference_forward(x, params)

        assert y.shape == (batch, out_d)
        # bf16 MXU operands with f32 accumulation -> loosened tolerance vs f32 reference
        assert jnp.allclose(y, y_ref, atol=5e-2, rtol=5e-2), \
            f"mismatch vs pure-JAX reference at batch={batch}"

    print("KERNEL_OK")
</pallas_src>

<mosaic_0001>
module attributes {stable_mosaic.version = 11 : i64} {
  func.func @kernel(%arg0: i32, %arg1: memref<256x16xf32, #tpu.memory_space<vmem>>, %arg2: memref<48x16xbf16, #tpu.memory_space<vmem>>, %arg3: memref<48x1xf32, #tpu.memory_space<vmem>>, %arg4: memref<48x48xbf16, #tpu.memory_space<vmem>>, %arg5: memref<48x1xf32, #tpu.memory_space<vmem>>, %arg6: memref<48x48xbf16, #tpu.memory_space<vmem>>, %arg7: memref<48x1xf32, #tpu.memory_space<vmem>>, %arg8: memref<32x48xbf16, #tpu.memory_space<vmem>>, %arg9: memref<32x1xf32, #tpu.memory_space<vmem>>, %arg10: memref<256x32xf32, #tpu.memory_space<vmem>>) attributes {dimension_semantics = [#tpu.dimension_semantics<parallel>], iteration_bounds = array<i64: 1>, scalar_prefetch = 0 : i64, scratch_operands = 0 : i64, tpu.core_type = #tpu.core_type<tc>, window_params = [{transform_indices = @transform_0, window_bounds = array<i64: 256, 16>}, {pipeline_mode = #tpu.pipeline_mode<synchronous>, transform_indices = @transform_1, window_bounds = array<i64: 48, 16>}, {pipeline_mode = #tpu.pipeline_mode<synchronous>, transform_indices = @transform_2, window_bounds = array<i64: 48, 1>}, {pipeline_mode = #tpu.pipeline_mode<synchronous>, transform_indices = @transform_3, window_bounds = array<i64: 48, 48>}, {pipeline_mode = #tpu.pipeline_mode<synchronous>, transform_indices = @transform_4, window_bounds = array<i64: 48, 1>}, {pipeline_mode = #tpu.pipeline_mode<synchronous>, transform_indices = @transform_5, window_bounds = array<i64: 48, 48>}, {pipeline_mode = #tpu.pipeline_mode<synchronous>, transform_indices = @transform_6, window_bounds = array<i64: 48, 1>}, {pipeline_mode = #tpu.pipeline_mode<synchronous>, transform_indices = @transform_7, window_bounds = array<i64: 32, 48>}, {pipeline_mode = #tpu.pipeline_mode<synchronous>, transform_indices = @transform_8, window_bounds = array<i64: 32, 1>}, {transform_indices = @transform_9, window_bounds = array<i64: 256, 32>}]} {
    %c0 = arith.constant 0 : index
    %c0_0 = arith.constant 0 : index
    %0 = vector.load %arg2[%c0, %c0_0] : memref<48x16xbf16, #tpu.memory_space<vmem>>, vector<48x16xbf16>
    %c0_1 = arith.constant 0 : index
    %c0_2 = arith.constant 0 : index
    %1 = vector.load %arg4[%c0_1, %c0_2] : memref<48x48xbf16, #tpu.memory_space<vmem>>, vector<48x48xbf16>
    %c0_3 = arith.constant 0 : index
    %c0_4 = arith.constant 0 : index
    %2 = vector.load %arg6[%c0_3, %c0_4] : memref<48x48xbf16, #tpu.memory_space<vmem>>, vector<48x48xbf16>
    %c0_5 = arith.constant 0 : index
    %c0_6 = arith.constant 0 : index
    %3 = vector.load %arg8[%c0_5, %c0_6] : memref<32x48xbf16, #tpu.memory_space<vmem>>, vector<32x48xbf16>
    %c0_7 = arith.constant 0 : index
    %c0_8 = arith.constant 0 : index
    %4 = vector.load %arg3[%c0_7, %c0_8] : memref<48x1xf32, #tpu.memory_space<vmem>>, vector<48x1xf32>
    %c0_9 = arith.constant 0 : index
    %c0_10 = arith.constant 0 : index
    %5 = vector.load %arg5[%c0_9, %c0_10] : memref<48x1xf32, #tpu.memory_space<vmem>>, vector<48x1xf32>
    %c0_11 = arith.constant 0 : index
    %c0_12 = arith.constant 0 : index
    %6 = vector.load %arg7[%c0_11, %c0_12] : memref<48x1xf32, #tpu.memory_space<vmem>>, vector<48x1xf32>
    %c0_13 = arith.constant 0 : index
    %c0_14 = arith.constant 0 : index
    %7 = vector.load %arg9[%c0_13, %c0_14] : memref<32x1xf32, #tpu.memory_space<vmem>>, vector<32x1xf32>
    %c0_i32 = arith.constant 0 : i32
    %c256_i32 = arith.constant 256 : i32
    %8 = arith.muli %c0_i32, %c256_i32 : i32
    %9 = tpu.assume_multiple %8, 256 : i32
    %10 = arith.index_cast %9 : i32 to index
    %c0_15 = arith.constant 0 : index
    %11 = vector.load %arg1[%10, %c0_15] : memref<256x16xf32, #tpu.memory_space<vmem>>, vector<256x16xf32>
    %12 = arith.truncf %11 : vector<256x16xf32> to vector<256x16xbf16>
    %cst = arith.constant dense<0.000000e+00> : vector<48x256xf32>
    %13 = tpu.matmul %0, %12, %cst {dimension_numbers = #tpu.dot_dimension_numbers<[1], [1], [0], [0], [0, 0, 1, 0], [], []>} : vector<48x16xbf16>, vector<256x16xbf16>, vector<48x256xf32> -> vector<48x256xf32>
    %14 = vector.broadcast %4 : vector<48x1xf32> to vector<48x256xf32>
    %15 = arith.addf %13, %14 : vector<48x256xf32>
    %cst_16 = arith.constant 0.000000e+00 : f32
    %16 = vector.broadcast %cst_16 : f32 to vector<48x256xf32>
    %17 = arith.maximumf %15, %16 : vector<48x256xf32>
    %18 = arith.truncf %17 : vector<48x256xf32> to vector<48x256xbf16>
    %cst_17 = arith.constant dense<0.000000e+00> : vector<48x256xf32>
    %19 = tpu.matmul %1, %18, %cst_17 {dimension_numbers = #tpu.dot_dimension_numbers<[1], [0], [0], [1], [0, 0, 1, 1], [], []>} : vector<48x48xbf16>, vector<48x256xbf16>, vector<48x256xf32> -> vector<48x256xf32>
    %20 = vector.broadcast %5 : vector<48x1xf32> to vector<48x256xf32>
    %21 = arith.addf %19, %20 : vector<48x256xf32>
    %cst_18 = arith.constant 0.000000e+00 : f32
    %22 = vector.broadcast %cst_18 : f32 to vector<48x256xf32>
    %23 = arith.maximumf %21, %22 : vector<48x256xf32>
    %24 = arith.truncf %23 : vector<48x256xf32> to vector<48x256xbf16>
    %cst_19 = arith.constant dense<0.000000e+00> : vector<48x256xf32>
    %25 = tpu.matmul %2, %24, %cst_19 {dimension_numbers = #tpu.dot_dimension_numbers<[1], [0], [0], [1], [0, 0, 1, 1], [], []>} : vector<48x48xbf16>, vector<48x256xbf16>, vector<48x256xf32> -> vector<48x256xf32>
    %26 = vector.broadcast %6 : vector<48x1xf32> to vector<48x256xf32>
    %27 = arith.addf %25, %26 : vector<48x256xf32>
    %cst_20 = arith.constant 0.000000e+00 : f32
    %28 = vector.broadcast %cst_20 : f32 to vector<48x256xf32>
    %29 = arith.maximumf %27, %28 : vector<48x256xf32>
    %30 = arith.truncf %29 : vector<48x256xf32> to vector<48x256xbf16>
    %cst_21 = arith.constant dense<0.000000e+00> : vector<32x256xf32>
    %31 = tpu.matmul %3, %30, %cst_21 {dimension_numbers = #tpu.dot_dimension_numbers<[1], [0], [0], [1], [0, 0, 1, 1], [], []>} : vector<32x48xbf16>, vector<48x256xbf16>, vector<32x256xf32> -> vector<32x256xf32>
    %32 = vector.broadcast %7 : vector<32x1xf32> to vector<32x256xf32>
    %33 = arith.addf %31, %32 : vector<32x256xf32>
    %34 = tpu.transpose %33, [1, 0] : vector<32x256xf32> -> vector<256x32xf32>
    %35 = arith.index_cast %9 : i32 to index
    %c0_22 = arith.constant 0 : index
    %36 = vector.load %arg10[%35, %c0_22] : memref<256x32xf32, #tpu.memory_space<vmem>>, vector<256x32xf32>
    tpu.vector_store %arg10[%35, %c0_22], %34 {strides = array<i32>} : memref<256x32xf32, #tpu.memory_space<vmem>>, vector<256x32xf32>,
    %c1_i32 = arith.constant 1 : i32
    return
  }
  func.func @transform_0(%arg0: i32) -> (i32, i32) {
    %c0_i32 = arith.constant 0 : i32
    %c0_i32_0 = arith.constant 0 : i32
    return %arg0, %c0_i32 : i32, i32
  }
  func.func @transform_1(%arg0: i32) -> (i32, i32) {
    %c0_i32 = arith.constant 0 : i32
    %c0_i32_0 = arith.constant 0 : i32
    %c0_i32_1 = arith.constant 0 : i32
    return %c0_i32, %c0_i32_0 : i32, i32
  }
  func.func @transform_2(%arg0: i32) -> (i32, i32) {
    %c0_i32 = arith.constant 0 : i32
    %c0_i32_0 = arith.constant 0 : i32
    %c0_i32_1 = arith.constant 0 : i32
    return %c0_i32, %c0_i32_0 : i32, i32
  }
  func.func @transform_3(%arg0: i32) -> (i32, i32) {
    %c0_i32 = arith.constant 0 : i32
    %c0_i32_0 = arith.constant 0 : i32
    %c0_i32_1 = arith.constant 0 : i32
    return %c0_i32, %c0_i32_0 : i32, i32
  }
  func.func @transform_4(%arg0: i32) -> (i32, i32) {
    %c0_i32 = arith.constant 0 : i32
    %c0_i32_0 = arith.constant 0 : i32
    %c0_i32_1 = arith.constant 0 : i32
    return %c0_i32, %c0_i32_0 : i32, i32
  }
  func.func @transform_5(%arg0: i32) -> (i32, i32) {
    %c0_i32 = arith.constant 0 : i32
    %c0_i32_0 = arith.constant 0 : i32
    %c0_i32_1 = arith.constant 0 : i32
    return %c0_i32, %c0_i32_0 : i32, i32
  }
  func.func @transform_6(%arg0: i32) -> (i32, i32) {
    %c0_i32 = arith.constant 0 : i32
    %c0_i32_0 = arith.constant 0 : i32
    %c0_i32_1 = arith.constant 0 : i32
    return %c0_i32, %c0_i32_0 : i32, i32
  }
  func.func @transform_7(%arg0: i32) -> (i32, i32) {
    %c0_i32 = arith.constant 0 : i32
    %c0_i32_0 = arith.constant 0 : i32
    %c0_i32_1 = arith.constant 0 : i32
    return %c0_i32, %c0_i32_0 : i32, i32
  }
  func.func @transform_8(%arg0: i32) -> (i32, i32) {
    %c0_i32 = arith.constant 0 : i32
    %c0_i32_0 = arith.constant 0 : i32
    %c0_i32_1 = arith.constant 0 : i32
    return %c0_i32, %c0_i32_0 : i32, i32
  }
  func.func @transform_9(%arg0: i32) -> (i32, i32) {
    %c0_i32 = arith.constant 0 : i32
    %c0_i32_0 = arith.constant 0 : i32
    return %arg0, %c0_i32 : i32, i32
  }
}

</mosaic_0001>

<bundles_post_ra>
// kernel: tpu_custom_call.1
= control target key start
LH: loop header
LB: loop body
LE: loop exit
PB: predicated region body
PF: predicated region fallthrough
CT: control target
= control target key end

     0   :  { %vm170_vm0 = vcmask 130048   ;;  %v798_v31 = vmov 0   ;;  %vm339_vm1 = vcmask 392192   ;;  %vm673_vm2 = vcmask 261120   ;;  %s1210_s0 = inlined_call_operand.vmem [shape: f32[256,16], index: 0, kind: input, shape index: {}]   ;;  %s1211_s2 = inlined_call_operand.vmem [shape: f32[48,1], index: 2, kind: input, shape index: {}]   ;;  %s1212_s4 = inlined_call_operand.vmem [shape: f32[48,1], index: 4, kind: input, shape index: {}]   ;;  %s1213_s6 = inlined_call_operand.vmem [shape: f32[48,1], index: 6, kind: input, shape index: {}]   ;;  %s1214_s1 = inlined_call_operand.vmem [shape: bf16[48,16], index: 1, kind: input, shape index: {}]   ;;  %s1215_s8 = inlined_call_operand.vmem [shape: f32[32,1], index: 8, kind: input, shape index: {}]   ;;  %s1216_s3 = inlined_call_operand.vmem [shape: bf16[48,48], index: 3, kind: input, shape index: {}]   ;;  %s1217_s5 = inlined_call_operand.vmem [shape: bf16[48,48], index: 5, kind: input, shape index: {}]   ;;  %s1218_s7 = inlined_call_operand.vmem [shape: bf16[32,48], index: 7, kind: input, shape index: {}]   ;;  %s1219_s9 = inlined_call_operand.vmem [shape: f32[256,32], index: 9, kind: output, shape index: {}]  }
   0x1   :  { %v91_v0 = vld [vmem:[%s1210_s0 + $0x70] sm:$0xff]  ;;  %v92_v1 = vld [vmem:[%s1210_s0 + $0x78] sm:$0xff]  ;;  %v89_v6 = vld [vmem:[%s1210_s0 + $0x60] sm:$0xff]  ;;  %795 = vset.pattern.permute.xlu0 %v798_v31  ;;  %796 = vset.pattern.permute.xlu1 %v798_v31 }
   0x2   :  { %v107_v2 = vld [vmem:[%s1210_s0 + $0xf0] sm:$0xff]  ;;  %v116_v3 = vpack.c.bf16 %v92_v1, %v91_v0  ;;  %v108_v4 = vld [vmem:[%s1210_s0 + $0xf8] sm:$0xff]  ;;  %v90_v7 = vld [vmem:[%s1210_s0 + $0x68] sm:$0xff]  ;;  %797 = vset.pattern.permute.xlu2 %v798_v31 }
   0x3   :  { %v124_v5 = vpack.c.bf16 %v108_v4, %v107_v2  ;;  %v105_v9 = vld [vmem:[%s1210_s0 + $0xe0] sm:$0xff]  ;;  %v106_v10 = vld [vmem:[%s1210_s0 + $0xe8] sm:$0xff]  ;;  %v115_v12 = vpack.c.bf16 %v90_v7, %v89_v6  ;;  %v87_v16 = vld [vmem:[%s1210_s0 + $0x50] sm:$0xff] }
   0x4   :  { %v202_v8 = vsel %vm170_vm0, %v116_v3, 0  ;;  %v123_v13 = vpack.c.bf16 %v106_v10, %v105_v9  ;;  %v88_v17 = vld [vmem:[%s1210_s0 + $0x58] sm:$0xff]  ;;  %v103_v18 = vld [vmem:[%s1210_s0 + $0xd0] sm:$0xff]  ;;  %v85_v24 = vld [vmem:[%s1210_s0 + $0x40] sm:$0xff] }
   0x5   :  { %228 = vmatpush.bf16.xpose.msra.mxu0 %v202_v8  ;;  %v226_v11 = vsel %vm170_vm0, %v124_v5, 0  ;;  %v199_v14 = vsel %vm170_vm0, %v115_v12, 0  ;;  %v104_v19 = vld [vmem:[%s1210_s0 + $0xd8] sm:$0xff]  ;;  %v114_v20 = vpack.c.bf16 %v88_v17, %v87_v16  ;;  %v86_v25 = vld [vmem:[%s1210_s0 + $0x48] sm:$0xff]  ;;  %v101_v26 = vld [vmem:[%s1210_s0 + $0xc0] sm:$0xff] }
   0x6   :  { %252 = vmatpush.bf16.xpose.msra.mxu1 %v226_v11  ;;  %v223_v15 = vsel %vm170_vm0, %v123_v13, 0  ;;  %v122_v21 = vpack.c.bf16 %v104_v19, %v103_v18  ;;  %v102_v27 = vld [vmem:[%s1210_s0 + $0xc8] sm:$0xff]  ;;  %v113_v28 = vpack.c.bf16 %v86_v25, %v85_v24  ;;  %v59_v29 = vld [vmem:[%s1211_s2 + $0x20] sm:$0xff]  ;;  %v83_v34 = vld [vmem:[%s1210_s0 + $0x30] sm:$0xff] }
   0x7   :  { %v196_v22 = vsel %vm170_vm0, %v114_v20, 0  ;;  %v121_v30 = vpack.c.bf16 %v102_v27, %v101_v26  ;;  %147 = vperm.xlu0 %795, %v59_v29   ;;  %v84_v35 = vld [vmem:[%s1210_s0 + $0x38] sm:$0xff]  ;;  %v99_v36 = vld [vmem:[%s1210_s0 + $0xb0] sm:$0xff]  ;;  %v60_v39 = vld [vmem:[%s1211_s2 + $0x28] sm:$0xff] }
   0x8   :  { %v220_v23 = vsel %vm170_vm0, %v122_v21, 0  ;;  %v193_v32 = vsel %vm170_vm0, %v113_v28, 0  ;;  %v100_v37 = vld [vmem:[%s1210_s0 + $0xb8] sm:$0xff]  ;;  %v112_v38 = vpack.c.bf16 %v84_v35, %v83_v34  ;;  %v57_v40 = vld [vmem:[%s1211_s2 + $0x10] sm:$0xff]  ;;  %v81_v44 = vld [vmem:[%s1210_s0 + $0x20] sm:$0xff] }
   0x9   :  { %v217_v33 = vsel %vm170_vm0, %v121_v30, 0  ;;  %v120_v41 = vpack.c.bf16 %v100_v37, %v99_v36  ;;  %137 = vperm.xlu1 %796, %v57_v40   ;;  %v82_v45 = vld [vmem:[%s1210_s0 + $0x28] sm:$0xff]  ;;  %v97_v46 = vld [vmem:[%s1210_s0 + $0xa0] sm:$0xff]  ;;  %v58_v49 = vld [vmem:[%s1211_s2 + $0x18] sm:$0xff] }
   0xa   :  { %v190_v42 = vsel %vm170_vm0, %v112_v38, 0  ;;  %v98_v47 = vld [vmem:[%s1210_s0 + $0xa8] sm:$0xff]  ;;  %v65_v48 = vld [vmem:[%s1212_s4 + $0x20] sm:$0xff]  ;;  %v111_v50 = vpack.c.bf16 %v82_v45, %v81_v44  ;;  %v79_v54 = vld [vmem:[%s1210_s0 + $0x10] sm:$0xff] }
   0xb   :  { %v214_v43 = vsel %vm170_vm0, %v120_v41, 0  ;;  %v119_v51 = vpack.c.bf16 %v98_v47, %v97_v46  ;;  %v80_v55 = vld [vmem:[%s1210_s0 + $0x18] sm:$0xff]  ;;  %v95_v56 = vld [vmem:[%s1210_s0 + $0x90] sm:$0xff]  ;;  %v66_v58 = vld [vmem:[%s1212_s4 + $0x28] sm:$0xff] }
   0xc   :  { %v187_v52 = vsel %vm170_vm0, %v111_v50, 0  ;;  %v96_v57 = vld [vmem:[%s1210_s0 + $0x98] sm:$0xff]  ;;  %v110_v60 = vpack.c.bf16 %v80_v55, %v79_v54  ;;  %v77_v0 = vld [vmem:[%s1210_s0] sm:$0xff]  ;;  %v78_v1 = vld [vmem:[%s1210_s0 + $0x8] sm:$0xff] }
   0xd   :  { %229 = vmatpush.bf16.xpose.msra.mxu0 %v199_v14  ;;  %v211_v53 = vsel %vm170_vm0, %v119_v51, 0  ;;  %v64_v59 = vld [vmem:[%s1212_s4 + $0x18] sm:$0xff]  ;;  %v118_v61 = vpack.c.bf16 %v96_v57, %v95_v56  ;;  %v93_v2 = vld [vmem:[%s1210_s0 + $0x80] sm:$0xff]  ;;  %v94_v3 = vld [vmem:[%s1210_s0 + $0x88] sm:$0xff]  ;;  %v109_v6 = vpack.c.bf16 %v78_v1, %v77_v0 }
   0xe   :  { %253 = vmatpush.bf16.xpose.msra.mxu1 %v223_v15  ;;  %v184_v62 = vsel %vm170_vm0, %v110_v60, 0  ;;  %v71_v4 = vld [vmem:[%s1213_s6 + $0x20] sm:$0xff]  ;;  %v117_v8 = vpack.c.bf16 %v94_v3, %v93_v2  ;;  %v72_v11 = vld [vmem:[%s1213_s6 + $0x28] sm:$0xff]  ;;  %v70_v12 = vld [vmem:[%s1213_s6 + $0x18] sm:$0xff] }
   0xf   :  { %152 = vperm.xlu0 %795, %v60_v39   ;;  %v208_v63 = vsel %vm170_vm0, %v118_v61, 0  ;;  %v61_v5 = vld [vmem:[%s1212_s4] sm:$0xff]  ;;  %v181_v9 = vsel %vm170_vm0, %v109_v6, 0  ;;  %v56_v15 = vld [vmem:[%s1211_s2 + $0x8] sm:$0xff]  ;;  %v63_v17 = vld [vmem:[%s1212_s4 + $0x10] sm:$0xff] }
  0x10   :  { %v55_v7 = vld [vmem:[%s1211_s2] sm:$0xff]  ;;  %v205_v10 = vsel %vm170_vm0, %v117_v8, 0  ;;  %v74_v18 = vld [vmem:[%s1215_s8 + $0x8] sm:$0xff]  ;;  %v76_v19 = vld [vmem:[%s1215_s8 + $0x18] sm:$0xff] }
  0x11   :  { %142 = vperm.xlu1 %796, %v58_v49   ;;  %127 = vperm.xlu2 %797, %v55_v7   ;;  %v776_v13 = vld [vmem:[%s1214_s1] sm:$0xff]  ;;  %v777_v20 = vld [vmem:[%s1214_s1 + $0x8] sm:$0xff]  ;;  %v75_v25 = vld [vmem:[%s1215_s8 + $0x10] sm:$0xff] }
  0x12   :  { %v73_v14 = vld [vmem:[%s1215_s8] sm:$0xff]  ;;  %v62_v21 = vld [vmem:[%s1212_s4 + $0x8] sm:$0xff] }
  0x13   :  { %v67_v16 = vld [vmem:[%s1213_s6] sm:$0xff]  ;;  %v68_v24 = vld [vmem:[%s1213_s6 + $0x8] sm:$0xff] }
  0x15   :  { %230 = vmatpush.bf16.xpose.msra.mxu0 %v196_v22  ;;  %v69_v22 = vld [vmem:[%s1213_s6 + $0x10] sm:$0xff] }
  0x16   :  { %254 = vmatpush.bf16.xpose.msra.mxu1 %v220_v23  ;;  %v778_v23 = vld [vmem:[%s1214_s1 + $0x10] sm:$0xff] }
  0x17   :  { %316 = vperm.xlu0 %795, %v65_v48  }
  0x19   :  { %321 = vperm.xlu1 %796, %v66_v58   ;;  %132 = vperm.xlu2 %797, %v56_v15  }
  0x1d   :  { %231 = vmatpush.bf16.xpose.msra.mxu0 %v193_v32 }
  0x1e   :  { %255 = vmatpush.bf16.xpose.msra.mxu1 %v217_v33 }
  0x1f   :  { %311 = vperm.xlu0 %795, %v64_v59  }
  0x21   :  { %296 = vperm.xlu1 %796, %v61_v5   ;;  %306 = vperm.xlu2 %797, %v63_v17  }
  0x25   :  { %232 = vmatpush.bf16.xpose.msra.mxu0 %v190_v42 }
  0x26   :  { %256 = vmatpush.bf16.xpose.msra.mxu1 %v214_v43 }
  0x27   :  { %437 = vperm.xlu0 %795, %v71_v4  }
  0x29   :  { %442 = vperm.xlu1 %796, %v72_v11   ;;  %301 = vperm.xlu2 %797, %v62_v21   ;;  %v780_v11 = vld [vmem:[%s1216_s3 + $0x8] sm:$0xff] }
  0x2d   :  { %233 = vmatpush.bf16.xpose.msra.mxu0 %v187_v52 }
  0x2e   :  { %257 = vmatpush.bf16.xpose.msra.mxu1 %v211_v53 }
  0x2f   :  { %432 = vperm.xlu0 %795, %v70_v12   ;;  %v781_v12 = vld [vmem:[%s1216_s3 + $0x10] sm:$0xff] }
  0x31   :  { %417 = vperm.xlu1 %796, %v67_v16   ;;  %427 = vperm.xlu2 %797, %v69_v22  }
  0x35   :  { %234 = vmatpush.bf16.xpose.msra.mxu0 %v184_v62 }
  0x36   :  { %258 = vmatpush.bf16.xpose.msra.mxu1 %v208_v63 }
  0x37   :  { %537 = vperm.xlu0 %795, %v73_v14  }
  0x39   :  { %542 = vperm.xlu1 %796, %v74_v18   ;;  %422 = vperm.xlu2 %797, %v68_v24  }
  0x3d   :  { %235 = vmatpush.bf16.xpose.msra.mxu0 %v181_v9 }
  0x3e   :  { %259 = vmatpush.bf16.xpose.msra.mxu1 %v205_v10  ;;  %v779_v10 = vld [vmem:[%s1216_s3] sm:$0xff] }
  0x3f   :  { %552 = vperm.xlu0 %795, %v76_v19  }
  0x41   :  { %547 = vperm.xlu2 %797, %v75_v25  }
  0x44   :  { %722 = vmatmul.msk.bf16.vlgmr.msra.gmra.mxu0 %vm170_vm0, %v776_v13 }
  0x45   :  { %725 = vmatmul.msk.bf16.vlgmr.msra.gmra.mxu1 %vm170_vm0, %v776_v13 }
  0x54   :  { %723 = vmatmul.msk.bf16.gmra.mxu0 %vm170_vm0, %v777_v20 }
  0x55   :  { %726 = vmatmul.msk.bf16.gmra.mxu1 %vm170_vm0, %v777_v20 }
  0x64   :  { %724 = vmatmul.msk.bf16.gmra.mxu0 %vm170_vm0, %v778_v23 }
  0x65   :  { %727 = vmatmul.msk.bf16.gmra.mxu1 %vm170_vm0, %v778_v23 }
  0x6b   :  { %v128_v38 = vpop.permute.xlu2 %127 }
  0x73   :  { %v133_v53 = vpop.permute.xlu2 %132 }
  0x79   :  { %v148_v34 = vpop.permute.xlu0 %147 }
  0x7b   :  { %v138_v35 = vpop.permute.xlu1 %137  ;;  %v307_v24 = vpop.permute.xlu2 %306 }
  0x81   :  { %v153_v39 = vpop.permute.xlu0 %152 }
  0x83   :  { %v143_v41 = vpop.permute.xlu1 %142 }
  0x89   :  { %v317_v21 = vpop.permute.xlu0 %316 }
  0x8b   :  { %v322_v25 = vpop.permute.xlu1 %321 }
  0xc1   :  { %v237_v26 = vpop.f32.mrf.mxu0 }
  0xc2   :  { %v261_v27 = vpop.f32.mrf.mxu1  ;;  %v238_v0 = vadd.f32 %v237_v26, %v128_v38 }
  0xc3   :  { %v262_v56 = vadd.f32 %v261_v27, %v128_v38  ;;  %v312_v27 = vpop.permute.xlu0 %311  ;;  %v302_v38 = vpop.permute.xlu2 %301 }
  0xc4   :  { %v276_v7 = vmax.f32 %v238_v0, 0.0 }
  0xc5   :  { %v277_v4 = vmax.f32 %v262_v56, 0.0 }
  0xc9   :  { %v239_v28 = vpop.f32.mrf.mxu0 }
  0xca   :  { %v263_v29 = vpop.f32.mrf.mxu1  ;;  %v240_v57 = vadd.f32 %v239_v28, %v133_v53 }
  0xcb   :  { %v264_v60 = vadd.f32 %v263_v29, %v133_v53 }
  0xcc   :  { %v278_v2 = vmax.f32 %v240_v57, 0.0 }
  0xcd   :  { %v279_v5 = vmax.f32 %v264_v60, 0.0 }
  0xce   :  { %v288_v8 = vpack.c.bf16 %v278_v2, %v276_v7 }
  0xcf   :  { %v289_v9 = vpack.c.bf16 %v279_v5, %v277_v4 }
  0xd1   :  { %v242_v30 = vpop.f32.mrf.mxu0 }
  0xd2   :  { %v266_v31 = vpop.f32.mrf.mxu1  ;;  %v243_v50 = vadd.f32 %v242_v30, %v138_v35 }
  0xd3   :  { %v267_v47 = vadd.f32 %v266_v31, %v138_v35 }
  0xd4   :  { %v280_v1 = vmax.f32 %v243_v50, 0.0 }
  0xd5   :  { %v281_v61 = vmax.f32 %v267_v47, 0.0 }
  0xd9   :  { %v244_v32 = vpop.f32.mrf.mxu0 }
  0xda   :  { %v268_v33 = vpop.f32.mrf.mxu1  ;;  %v245_v44 = vadd.f32 %v244_v32, %v143_v41 }
  0xdb   :  { %v269_v48 = vadd.f32 %v268_v33, %v143_v41 }
  0xdc   :  { %v282_v58 = vmax.f32 %v245_v44, 0.0 }
  0xdd   :  { %v283_v62 = vmax.f32 %v269_v48, 0.0 }
  0xde   :  { %v290_v3 = vpack.c.bf16 %v282_v58, %v280_v1 }
  0xdf   :  { %v291_v6 = vpack.c.bf16 %v283_v62, %v281_v61  ;;  %v782_v61 = vld [vmem:[%s1217_s5] sm:$0xff]  ;;  %v783_v62 = vld [vmem:[%s1217_s5 + $0x8] sm:$0xff] }
  0xe1   :  { %v247_v36 = vpop.f32.mrf.mxu0 }
  0xe2   :  { %v271_v37 = vpop.f32.mrf.mxu1  ;;  %v248_v40 = vadd.f32 %v247_v36, %v148_v34 }
  0xe3   :  { %v272_v42 = vadd.f32 %v271_v37, %v148_v34 }
  0xe4   :  { %v284_v51 = vmax.f32 %v248_v40, 0.0 }
  0xe5   :  { %v285_v54 = vmax.f32 %v272_v42, 0.0 }
  0xe9   :  { %v249_v43 = vpop.f32.mrf.mxu0 }
  0xea   :  { %v250_v45 = vadd.f32 %v249_v43, %v153_v39  ;;  %v273_v46 = vpop.f32.mrf.mxu1 }
  0xeb   :  { %v274_v49 = vadd.f32 %v273_v46, %v153_v39 }
  0xec   :  { %v286_v52 = vmax.f32 %v250_v45, 0.0  ;;  %v297_v45 = vpop.permute.xlu1 %296 }
  0xed   :  { %v287_v55 = vmax.f32 %v274_v49, 0.0 }
  0xee   :  { %v292_v59 = vpack.c.bf16 %v286_v52, %v284_v51 }
  0xef   :  { %v293_v63 = vpack.c.bf16 %v287_v55, %v285_v54 }
  0xf0   :  { %354 = vmatpush.bf16.msra.mxu2 %v292_v59 }
  0xf1   :  { %378 = vmatpush.bf16.msra.mxu3 %v293_v63  ;;  %v784_v63 = vld [vmem:[%s1217_s5 + $0x10] sm:$0xff] }
  0xf4   :  { %355 = vmatpush.bf16.msra.mxu2 %v290_v3 }
  0xf5   :  { %379 = vmatpush.bf16.msra.mxu3 %v291_v6 }
  0xf8   :  { %356 = vmatpush.bf16.msra.mxu2 %v288_v8  ;;  %v438_v8 = vpop.permute.xlu0 %437 }
  0xf9   :  { %380 = vmatpush.bf16.msra.mxu3 %v289_v9 }
  0xfb   :  { %740 = vmatmul.msk.bf16.vlgmr.msra.gmra.mxu2 %vm339_vm1, %v779_v10 }
  0xfc   :  { %743 = vmatmul.msk.bf16.vlgmr.msra.gmra.mxu3 %vm339_vm1, %v779_v10 }
 0x10b   :  { %741 = vmatmul.msk.bf16.gmra.mxu2 %vm339_vm1, %v780_v11 }
 0x10c   :  { %744 = vmatmul.msk.bf16.gmra.mxu3 %vm339_vm1, %v780_v11  ;;  %v428_v11 = vpop.permute.xlu2 %427 }
 0x11b   :  { %742 = vmatmul.msk.bf16.gmra.mxu2 %vm339_vm1, %v781_v12 }
 0x11c   :  { %745 = vmatmul.msk.bf16.gmra.mxu3 %vm339_vm1, %v781_v12  ;;  %v443_v12 = vpop.permute.xlu1 %442 }
 0x17e   :  { %v358_v13 = vpop.f32.mrf.mxu2 }
 0x17f   :  { %v382_v14 = vpop.f32.mrf.mxu3  ;;  %v359_v49 = vadd.f32 %v358_v13, %v297_v45 }
 0x180   :  { %v383_v51 = vadd.f32 %v382_v14, %v297_v45  ;;  %v433_v14 = vpop.permute.xlu0 %432 }
 0x181   :  { %v397_v57 = vmax.f32 %v359_v49, 0.0  ;;  %v786_v49 = vld [vmem:[%s1218_s7 + $0x8] sm:$0xff] }
 0x182   :  { %v398_v58 = vmax.f32 %v383_v51, 0.0 }
 0x186   :  { %v360_v15 = vpop.f32.mrf.mxu2 }
 0x187   :  { %v384_v16 = vpop.f32.mrf.mxu3  ;;  %v361_v42 = vadd.f32 %v360_v15, %v302_v38 }
 0x188   :  { %v385_v46 = vadd.f32 %v384_v16, %v302_v38 }
 0x189   :  { %v399_v53 = vmax.f32 %v361_v42, 0.0 }
 0x18a   :  { %v400_v55 = vmax.f32 %v385_v46, 0.0 }
 0x18b   :  { %v409_v59 = vpack.c.bf16 %v399_v53, %v397_v57 }
 0x18c   :  { %v410_v60 = vpack.c.bf16 %v400_v55, %v398_v58 }
 0x18e   :  { %v363_v17 = vpop.f32.mrf.mxu2 }
 0x18f   :  { %v387_v18 = vpop.f32.mrf.mxu3  ;;  %v364_v35 = vadd.f32 %v363_v17, %v307_v24 }
 0x190   :  { %v388_v39 = vadd.f32 %v387_v18, %v307_v24 }
 0x191   :  { %v401_v50 = vmax.f32 %v364_v35, 0.0 }
 0x192   :  { %v402_v52 = vmax.f32 %v388_v39, 0.0 }
 0x196   :  { %v365_v19 = vpop.f32.mrf.mxu2 }
 0x197   :  { %v389_v20 = vpop.f32.mrf.mxu3  ;;  %v366_v30 = vadd.f32 %v365_v19, %v312_v27 }
 0x198   :  { %v390_v33 = vadd.f32 %v389_v20, %v312_v27 }
 0x199   :  { %v403_v43 = vmax.f32 %v366_v30, 0.0 }
 0x19a   :  { %v404_v47 = vmax.f32 %v390_v33, 0.0 }
 0x19b   :  { %v411_v54 = vpack.c.bf16 %v403_v43, %v401_v50  ;;  %v538_v50 = vpop.permute.xlu0 %537 }
 0x19c   :  { %v412_v56 = vpack.c.bf16 %v404_v47, %v402_v52 }
 0x19e   :  { %v368_v22 = vpop.f32.mrf.mxu2 }
 0x19f   :  { %v392_v23 = vpop.f32.mrf.mxu3  ;;  %v369_v26 = vadd.f32 %v368_v22, %v317_v21 }
 0x1a0   :  { %v393_v28 = vadd.f32 %v392_v23, %v317_v21 }
 0x1a1   :  { %v405_v36 = vmax.f32 %v369_v26, 0.0 }
 0x1a2   :  { %v406_v40 = vmax.f32 %v393_v28, 0.0 }
 0x1a6   :  { %v370_v29 = vpop.f32.mrf.mxu2 }
 0x1a7   :  { %v371_v31 = vadd.f32 %v370_v29, %v322_v25  ;;  %v394_v32 = vpop.f32.mrf.mxu3 }
 0x1a8   :  { %v395_v34 = vadd.f32 %v394_v32, %v322_v25  ;;  %v423_v25 = vpop.permute.xlu2 %422  ;;  %v418_v32 = vpop.permute.xlu1 %417 }
 0x1a9   :  { %v407_v37 = vmax.f32 %v371_v31, 0.0 }
 0x1aa   :  { %v408_v41 = vmax.f32 %v395_v34, 0.0 }
 0x1ab   :  { %v413_v44 = vpack.c.bf16 %v407_v37, %v405_v36 }
 0x1ac   :  { %v414_v48 = vpack.c.bf16 %v408_v41, %v406_v40 }
 0x1ad   :  { %474 = vmatpush.bf16.msrb.mxu2 %v413_v44 }
 0x1ae   :  { %498 = vmatpush.bf16.msrb.mxu3 %v414_v48  ;;  %v785_v48 = vld [vmem:[%s1218_s7] sm:$0xff] }
 0x1b0   :  { %v543_v55 = vpop.permute.xlu1 %542 }
 0x1b1   :  { %475 = vmatpush.bf16.msrb.mxu2 %v411_v54 }
 0x1b2   :  { %499 = vmatpush.bf16.msrb.mxu3 %v412_v56 }
 0x1b5   :  { %476 = vmatpush.bf16.msrb.mxu2 %v409_v59 }
 0x1b6   :  { %500 = vmatpush.bf16.msrb.mxu3 %v410_v60 }
 0x1b8   :  { %758 = vmatmul.msk.bf16.vlgmr.msrb.gmra.mxu2 %vm339_vm1, %v782_v61 }
 0x1b9   :  { %761 = vmatmul.msk.bf16.vlgmr.msrb.gmra.mxu3 %vm339_vm1, %v782_v61 }
 0x1c8   :  { %759 = vmatmul.msk.bf16.gmra.mxu2 %vm339_vm1, %v783_v62 }
 0x1c9   :  { %762 = vmatmul.msk.bf16.gmra.mxu3 %vm339_vm1, %v783_v62  ;;  %v548_v62 = vpop.permute.xlu2 %547 }
 0x1d8   :  { %760 = vmatmul.msk.bf16.gmra.mxu2 %vm339_vm1, %v784_v63 }
 0x1d9   :  { %763 = vmatmul.msk.bf16.gmra.mxu3 %vm339_vm1, %v784_v63 }
 0x23b   :  { %v478_v0 = vpop.f32.mrf.mxu2 }
 0x23c   :  { %v502_v1 = vpop.f32.mrf.mxu3  ;;  %v479_v36 = vadd.f32 %v478_v0, %v418_v32 }
 0x23d   :  { %v503_v38 = vadd.f32 %v502_v1, %v418_v32 }
 0x23e   :  { %v517_v44 = vmax.f32 %v479_v36, 0.0 }
 0x23f   :  { %v518_v45 = vmax.f32 %v503_v38, 0.0 }
 0x243   :  { %v480_v2 = vpop.f32.mrf.mxu2 }
 0x244   :  { %v504_v3 = vpop.f32.mrf.mxu3  ;;  %v481_v29 = vadd.f32 %v480_v2, %v423_v25 }
 0x245   :  { %v505_v33 = vadd.f32 %v504_v3, %v423_v25  ;;  %v553_v3 = vpop.permute.xlu0 %552 }
 0x246   :  { %v519_v40 = vmax.f32 %v481_v29, 0.0 }
 0x247   :  { %v520_v42 = vmax.f32 %v505_v33, 0.0 }
 0x248   :  { %v529_v46 = vpack.c.bf16 %v519_v40, %v517_v44 }
 0x249   :  { %v530_v47 = vpack.c.bf16 %v520_v42, %v518_v45 }
 0x24b   :  { %v483_v4 = vpop.f32.mrf.mxu2 }
 0x24c   :  { %v507_v5 = vpop.f32.mrf.mxu3  ;;  %v484_v22 = vadd.f32 %v483_v4, %v428_v11 }
 0x24d   :  { %v508_v26 = vadd.f32 %v507_v5, %v428_v11 }
 0x24e   :  { %v521_v37 = vmax.f32 %v484_v22, 0.0 }
 0x24f   :  { %v522_v39 = vmax.f32 %v508_v26, 0.0 }
 0x253   :  { %v485_v6 = vpop.f32.mrf.mxu2 }
 0x254   :  { %v509_v7 = vpop.f32.mrf.mxu3  ;;  %v486_v17 = vadd.f32 %v485_v6, %v433_v14 }
 0x255   :  { %v510_v20 = vadd.f32 %v509_v7, %v433_v14 }
 0x256   :  { %v523_v30 = vmax.f32 %v486_v17, 0.0 }
 0x257   :  { %v524_v34 = vmax.f32 %v510_v20, 0.0 }
 0x258   :  { %v531_v41 = vpack.c.bf16 %v523_v30, %v521_v37 }
 0x259   :  { %v532_v43 = vpack.c.bf16 %v524_v34, %v522_v39 }
 0x25b   :  { %v488_v9 = vpop.f32.mrf.mxu2 }
 0x25c   :  { %v512_v10 = vpop.f32.mrf.mxu3  ;;  %v489_v13 = vadd.f32 %v488_v9, %v438_v8 }
 0x25d   :  { %v513_v15 = vadd.f32 %v512_v10, %v438_v8 }
 0x25e   :  { %v525_v23 = vmax.f32 %v489_v13, 0.0 }
 0x25f   :  { %v526_v27 = vmax.f32 %v513_v15, 0.0 }
 0x263   :  { %v490_v16 = vpop.f32.mrf.mxu2 }
 0x264   :  { %v491_v18 = vadd.f32 %v490_v16, %v443_v12  ;;  %v514_v19 = vpop.f32.mrf.mxu3 }
 0x265   :  { %v515_v21 = vadd.f32 %v514_v19, %v443_v12 }
 0x266   :  { %v527_v24 = vmax.f32 %v491_v18, 0.0 }
 0x267   :  { %v528_v28 = vmax.f32 %v515_v21, 0.0 }
 0x268   :  { %v533_v31 = vpack.c.bf16 %v527_v24, %v525_v23 }
 0x269   :  { %v534_v35 = vpack.c.bf16 %v528_v28, %v526_v27 }
 0x26a   :  { %576 = vmatpush.bf16.msrb.mxu0 %v533_v31  ;;  %787 = vmatpush.bf16.msra.mxu2 %v533_v31 }
 0x26b   :  { %595 = vmatpush.bf16.msrb.mxu1 %v534_v35  ;;  %790 = vmatpush.bf16.msra.mxu3 %v534_v35 }
 0x26e   :  { %577 = vmatpush.bf16.msrb.mxu0 %v531_v41  ;;  %788 = vmatpush.bf16.msra.mxu2 %v531_v41 }
 0x26f   :  { %596 = vmatpush.bf16.msrb.mxu1 %v532_v43  ;;  %791 = vmatpush.bf16.msra.mxu3 %v532_v43 }
 0x272   :  { %578 = vmatpush.bf16.msrb.mxu0 %v529_v46  ;;  %789 = vmatpush.bf16.msra.mxu2 %v529_v46 }
 0x273   :  { %597 = vmatpush.bf16.msrb.mxu1 %v530_v47  ;;  %792 = vmatpush.bf16.msra.mxu3 %v530_v47 }
 0x275   :  { %772 = vmatmul.msk.bf16.vlgmr.msrb.gmra.mxu0 %vm339_vm1, %v785_v48  ;;  %773 = vmatmul.msk.bf16.vlgmr.msra.gmra.mxu2 %vm339_vm1, %v786_v49 }
 0x276   :  { %774 = vmatmul.msk.bf16.vlgmr.msrb.gmra.mxu1 %vm339_vm1, %v785_v48  ;;  %775 = vmatmul.msk.bf16.vlgmr.msra.gmra.mxu3 %vm339_vm1, %v786_v49 }
 0x2f2   :  { %v580_v51 = vpop.f32.mrf.mxu0 }
 0x2f3   :  { %v581_v52 = vadd.f32 %v580_v51, %v538_v50  ;;  %v599_v53 = vpop.f32.mrf.mxu1 }
 0x2f4   :  { %v600_v54 = vadd.f32 %v599_v53, %v538_v50 }
 0x2f5   :  { %609 = vxpose.xlu1.b32.start [1/4] (short) %v581_v52, 128 }
 0x2f6   :  { %641 = vxpose.xlu2.b32.start [1/4] (short) %v600_v54, 128 }
 0x2f8   :  { %v585_v60 = vpop.f32.mrf.mxu2 }
 0x2f9   :  { %v604_v61 = vpop.f32.mrf.mxu3  ;;  %v586_v63 = vadd.f32 %v585_v60, %v548_v62 }
 0x2fa   :  { %v582_v56 = vpop.f32.mrf.mxu0  ;;  %v605_v0 = vadd.f32 %v604_v61, %v548_v62 }
 0x2fb   :  { %v583_v57 = vadd.f32 %v582_v56, %v543_v55  ;;  %v601_v58 = vpop.f32.mrf.mxu1 }
 0x2fc   :  { %v602_v59 = vadd.f32 %v601_v58, %v543_v55 }
 0x2fd   :  { %610 = vxpose.xlu1.b32.cont [2/4] (short) %v583_v57, 128 }
 0x2fe   :  { %642 = vxpose.xlu2.b32.cont [2/4] (short) %v602_v59, 128 }
 0x300   :  { %v587_v1 = vpop.f32.mrf.mxu2 }
 0x301   :  { %v606_v2 = vpop.f32.mrf.mxu3  ;;  %v588_v4 = vadd.f32 %v587_v1, %v553_v3 }
 0x302   :  { %v607_v5 = vadd.f32 %v606_v2, %v553_v3 }
 0x305   :  { %611 = vxpose.xlu1.b32.cont [3/4] (short) %v586_v63, 128 }
 0x306   :  { %643 = vxpose.xlu2.b32.cont [3/4] (short) %v605_v0, 128 }
 0x30d   :  { %612 = vxpose.xlu1.b32.end [4/4] (short) %v588_v4, 128 }
 0x30e   :  { %644 = vxpose.xlu2.b32.end [4/4] (short) %v607_v5, 128 }
 0x38f   :  { %v657_v6 = vpop.trf.xlu2 }
 0x390   :  { %690 = vst.msk [vmem:[%s1219_s9 + $0x80] sm:$0xff] %vm673_vm2, %v657_v6 }
 0x397   :  { %v658_v7 = vpop.trf.xlu2 }
 0x398   :  { %691 = vst.msk [vmem:[%s1219_s9 + $0x88] sm:$0xff] %vm673_vm2, %v658_v7 }
 0x399   :  { %v625_v8 = vpop.trf.xlu1 }
 0x39a   :  { %674 = vst.msk [vmem:[%s1219_s9] sm:$0xff] %vm673_vm2, %v625_v8 }
 0x39f   :  { %v659_v9 = vpop.trf.xlu2 }
 0x3a0   :  { %692 = vst.msk [vmem:[%s1219_s9 + $0x90] sm:$0xff] %vm673_vm2, %v659_v9 }
 0x3a1   :  { %v626_v10 = vpop.trf.xlu1 }
 0x3a2   :  { %675 = vst.msk [vmem:[%s1219_s9 + $0x8] sm:$0xff] %vm673_vm2, %v626_v10 }
 0x3a7   :  { %v660_v11 = vpop.trf.xlu2 }
 0x3a8   :  { %693 = vst.msk [vmem:[%s1219_s9 + $0x98] sm:$0xff] %vm673_vm2, %v660_v11 }
 0x3a9   :  { %v627_v12 = vpop.trf.xlu1 }
 0x3aa   :  { %676 = vst.msk [vmem:[%s1219_s9 + $0x10] sm:$0xff] %vm673_vm2, %v627_v12 }
 0x3af   :  { %v661_v13 = vpop.trf.xlu2 }
 0x3b0   :  { %694 = vst.msk [vmem:[%s1219_s9 + $0xa0] sm:$0xff] %vm673_vm2, %v661_v13 }
 0x3b1   :  { %v628_v14 = vpop.trf.xlu1 }
 0x3b2   :  { %677 = vst.msk [vmem:[%s1219_s9 + $0x18] sm:$0xff] %vm673_vm2, %v628_v14 }
 0x3b7   :  { %v662_v15 = vpop.trf.xlu2 }
 0x3b8   :  { %695 = vst.msk [vmem:[%s1219_s9 + $0xa8] sm:$0xff] %vm673_vm2, %v662_v15 }
 0x3b9   :  { %v629_v16 = vpop.trf.xlu1 }
 0x3ba   :  { %678 = vst.msk [vmem:[%s1219_s9 + $0x20] sm:$0xff] %vm673_vm2, %v629_v16 }
 0x3bf   :  { %v663_v17 = vpop.trf.xlu2 }
 0x3c0   :  { %696 = vst.msk [vmem:[%s1219_s9 + $0xb0] sm:$0xff] %vm673_vm2, %v663_v17 }
 0x3c1   :  { %v630_v18 = vpop.trf.xlu1 }
 0x3c2   :  { %679 = vst.msk [vmem:[%s1219_s9 + $0x28] sm:$0xff] %vm673_vm2, %v630_v18 }
 0x3c7   :  { %v664_v19 = vpop.trf.xlu2 }
 0x3c8   :  { %697 = vst.msk [vmem:[%s1219_s9 + $0xb8] sm:$0xff] %vm673_vm2, %v664_v19 }
 0x3c9   :  { %v631_v20 = vpop.trf.xlu1 }
 0x3ca   :  { %680 = vst.msk [vmem:[%s1219_s9 + $0x30] sm:$0xff] %vm673_vm2, %v631_v20 }
 0x3cf   :  { %v665_v21 = vpop.trf.xlu2 }
 0x3d0   :  { %698 = vst.msk [vmem:[%s1219_s9 + $0xc0] sm:$0xff] %vm673_vm2, %v665_v21 }
 0x3d1   :  { %v632_v22 = vpop.trf.xlu1 }
 0x3d2   :  { %681 = vst.msk [vmem:[%s1219_s9 + $0x38] sm:$0xff] %vm673_vm2, %v632_v22 }
 0x3d7   :  { %v666_v23 = vpop.trf.xlu2 }
 0x3d8   :  { %699 = vst.msk [vmem:[%s1219_s9 + $0xc8] sm:$0xff] %vm673_vm2, %v666_v23 }
 0x3d9   :  { %v633_v24 = vpop.trf.xlu1 }
 0x3da   :  { %682 = vst.msk [vmem:[%s1219_s9 + $0x40] sm:$0xff] %vm673_vm2, %v633_v24 }
 0x3df   :  { %v667_v25 = vpop.trf.xlu2 }
 0x3e0   :  { %700 = vst.msk [vmem:[%s1219_s9 + $0xd0] sm:$0xff] %vm673_vm2, %v667_v25 }
 0x3e1   :  { %v634_v26 = vpop.trf.xlu1 }
 0x3e2   :  { %683 = vst.msk [vmem:[%s1219_s9 + $0x48] sm:$0xff] %vm673_vm2, %v634_v26 }
 0x3e7   :  { %v668_v27 = vpop.trf.xlu2 }
 0x3e8   :  { %701 = vst.msk [vmem:[%s1219_s9 + $0xd8] sm:$0xff] %vm673_vm2, %v668_v27 }
 0x3e9   :  { %v635_v28 = vpop.trf.xlu1 }
 0x3ea   :  { %684 = vst.msk [vmem:[%s1219_s9 + $0x50] sm:$0xff] %vm673_vm2, %v635_v28 }
 0x3ef   :  { %v669_v29 = vpop.trf.xlu2 }
 0x3f0   :  { %702 = vst.msk [vmem:[%s1219_s9 + $0xe0] sm:$0xff] %vm673_vm2, %v669_v29 }
 0x3f1   :  { %v636_v30 = vpop.trf.xlu1 }
 0x3f2   :  { %685 = vst.msk [vmem:[%s1219_s9 + $0x58] sm:$0xff] %vm673_vm2, %v636_v30 }
 0x3f7   :  { %v670_v31 = vpop.trf.xlu2 }
 0x3f8   :  { %703 = vst.msk [vmem:[%s1219_s9 + $0xe8] sm:$0xff] %vm673_vm2, %v670_v31 }
 0x3f9   :  { %v637_v32 = vpop.trf.xlu1 }
 0x3fa   :  { %686 = vst.msk [vmem:[%s1219_s9 + $0x60] sm:$0xff] %vm673_vm2, %v637_v32 }
 0x3ff   :  { %v671_v33 = vpop.trf.xlu2 }
 0x400   :  { %704 = vst.msk [vmem:[%s1219_s9 + $0xf0] sm:$0xff] %vm673_vm2, %v671_v33 }
 0x401   :  { %v638_v34 = vpop.trf.xlu1 }
 0x402   :  { %687 = vst.msk [vmem:[%s1219_s9 + $0x68] sm:$0xff] %vm673_vm2, %v638_v34 }
 0x407   :  { %v672_v35 = vpop.trf.xlu2 }
 0x408   :  { %705 = vst.msk [vmem:[%s1219_s9 + $0xf8] sm:$0xff] %vm673_vm2, %v672_v35 }
 0x409   :  { %v639_v36 = vpop.trf.xlu1 }
 0x40a   :  { %688 = vst.msk [vmem:[%s1219_s9 + $0x70] sm:$0xff] %vm673_vm2, %v639_v36 }
 0x411   :  { %v640_v37 = vpop.trf.xlu1 }
 0x412   :  { %689 = vst.msk [vmem:[%s1219_s9 + $0x78] sm:$0xff] %vm673_vm2, %v640_v37 }

</bundles_post_ra>
